<compile_context>
chip_gen: v6e
topology: v6e:2x2x1
jax: 0.10.0
libtpu: 0.0.40
codegen_flags: <defaults>
</compile_context>

<pallas_src>
import functools

import jax
import jax.numpy as jnp
from jax.experimental import pallas as pl
from jax.experimental.pallas import tpu as pltpu


def _cdiv(a, b):
    return (a + b - 1) // b


def _round_up(a, b):
    return _cdiv(a, b) * b


# ----------------------------- kernels --------------------------------------


def _mm_bias_kernel(x_ref, w_ref, b_ref, o_ref, *, cdt):
    # x_ref: (tm, K)  w_ref: (K, tn)  b_ref: (1, tn) f32  o_ref: (tm, tn)
    xb = x_ref[...]
    if cdt is not None:
        xb = xb.astype(cdt)  # VPU cast in VMEM, hidden under MXU/DMA
    acc = jnp.dot(xb, w_ref[...], preferred_element_type=jnp.float32)
    o_ref[...] = (acc + b_ref[...]).astype(o_ref.dtype)


def _mm_bias_kernel_ktiled(x_ref, w_ref, b_ref, o_ref, acc_ref, *, cdt, k_rem):
    # Same as above but with a K reduction grid axis (last) and an f32
    # accumulator that stays resident across the K steps of one (i, j) tile.
    k = pl.program_id(2)
    nk = pl.num_programs(2)

    @pl.when(k == 0)
    def _():
        acc_ref[...] = jnp.zeros_like(acc_ref)

    xb = x_ref[...]
    wb = w_ref[...]
    if k_rem:
        # The last K block sticks out past K: zero both operands' tails so
        # masked-read garbage (possibly NaN/Inf) can never reach the
        # accumulator of VALID output elements.
        limit = jnp.where(k == nk - 1, k_rem, xb.shape[-1])
        lane = jax.lax.broadcasted_iota(jnp.int32, xb.shape, 1)
        xb = jnp.where(lane < limit, xb, jnp.zeros_like(xb))
        row = jax.lax.broadcasted_iota(jnp.int32, wb.shape, 0)
        wb = jnp.where(row < limit, wb, jnp.zeros_like(wb))
    if cdt is not None:
        xb = xb.astype(cdt)
    acc_ref[...] += jnp.dot(xb, wb, preferred_element_type=jnp.float32)

    @pl.when(k == nk - 1)
    def _():
        o_ref[...] = (acc_ref[...] + b_ref[...]).astype(o_ref.dtype)


# --------------------------- tiling policy -----------------------------------


def _vmem_policy():
    """Generation-aware (tile-footprint budget, scoped-vmem limit) in bytes."""
    try:
        cap = int(pltpu.get_tpu_info().vmem_capacity_bytes)
    except Exception:
        # Off-TPU tracing / older API: assume the smallest per-core VMEM (v7x).
        cap = 64 * 1024 * 1024
    budget = min(int(cap * 0.40), 56 * 1024 * 1024)   # v7x ~25 MiB, v5e/v6e ~51 MiB
    limit = min(int(cap * 0.75), 96 * 1024 * 1024)    # v7x 48 MiB, v5e/v6e 96 MiB
    return budget, limit


def _choose_tiles(M, N, K, x_isz, w_isz, o_isz, block_m, block_n, block_k, budget):
    LANE = 128
    sub = 8
    for isz in (x_isz, o_isz):
        sub = max(sub, 32 // isz)   # bf16 rows pack 16 per sublane group

    # N tile: lane-dense multiple of 128, MXU-width friendly.
    tn = min(_round_up(N, LANE), _round_up(block_n, LANE))

    # M tile: multiple of the sublane pack; aim for >= ~4 tiles when M allows
    # it (pipelining on all gens, both TensorCores on v7x).
    if M <= sub:
        tm = M                      # full-extent block (always legal)
    else:
        tm = min(_round_up(min(block_m, M), sub),
                 max(sub, _round_up(_cdiv(M, 4), sub)))

    # K tile: full K unless forced by block_k or by the VMEM budget.
    if block_k is not None and _round_up(block_k, LANE) < K:
        tk = _round_up(block_k, LANE)
    else:
        tk = K

    def footprint(tm_, tn_, tk_):
        ktiled = tk_ < K
        xb = 2 * tm_ * tk_ * x_isz              # double-buffered activation
        wb = 2 * tk_ * tn_ * w_isz              # double-buffered weight
        ob = 2 * tm_ * tn_ * o_isz              # double-buffered output
        bb = 2 * tn_ * 4                        # bias (f32)
        ab = tm_ * tn_ * 4 if ktiled else 0     # f32 accumulator scratch
        return xb + wb + ob + bb + ab

    # Over-budget resolution order: tn -> tm (down to ~128) -> K tiling ->
    # tm below 128 only as a last resort (tiny M tiles waste the MXU and make
    # every grid step per-step-overhead dominated).
    while footprint(tm, tn, tk) > budget and tn > LANE:
        tn -= LANE
    tm_floor = min(tm, _round_up(min(M, 128), sub))
    while footprint(tm, tn, tk) > budget and tm - sub >= tm_floor:
        tm -= sub
    if tk == K and footprint(tm, tn, tk) > budget and K > LANE:
        tk = max(LANE, (K // LANE) * LANE)
        while footprint(tm, tn, tk) > budget and tk > LANE:
            tk -= LANE
    while footprint(tm, tn, tk) > budget and tm - sub >= sub:
        tm -= sub

    return tm, tn, tk


# ---------------------------- pallas_call -----------------------------------


def _pallas_matmul_bias(x2d, w, b, *, tm, tn, tk, out_dtype, cdt, vmem_limit_bytes):
    M, K = x2d.shape
    N = b.shape[1]
    gm = _cdiv(M, tm)
    gn = _cdiv(N, tn)
    gk = _cdiv(K, tk)

    if gk == 1:
        kernel = functools.partial(_mm_bias_kernel, cdt=cdt)
        grid = (gm, gn)
        in_specs = [
            pl.BlockSpec((tm, K), lambda i, j: (i, 0)),
            pl.BlockSpec((K, tn), lambda i, j: (0, j)),
            pl.BlockSpec((1, tn), lambda i, j: (0, j)),
        ]
        out_specs = pl.BlockSpec((tm, tn), lambda i, j: (i, j))
        scratch_shapes = []
        dims = ("parallel", "parallel")
    else:
        kernel = functools.partial(_mm_bias_kernel_ktiled, cdt=cdt, k_rem=K % tk)
        grid = (gm, gn, gk)   # reduction axis last
        in_specs = [
            pl.BlockSpec((tm, tk), lambda i, j, k: (i, k)),
            pl.BlockSpec((tk, tn), lambda i, j, k: (k, j)),
            pl.BlockSpec((1, tn), lambda i, j, k: (0, j)),
        ]
        out_specs = pl.BlockSpec((tm, tn), lambda i, j, k: (i, j))
        scratch_shapes = [pltpu.VMEM((tm, tn), jnp.float32)]
        dims = ("parallel", "parallel", "arbitrary")

    return pl.pallas_call(
        kernel,
        out_shape=jax.ShapeDtypeStruct((M, N), out_dtype),
        grid_spec=pltpu.PrefetchScalarGridSpec(
            num_scalar_prefetch=0,
            grid=grid,
            in_specs=in_specs,
            out_specs=out_specs,
            scratch_shapes=scratch_shapes,
        ),
        compiler_params=pltpu.CompilerParams(
            dimension_semantics=dims,
            vmem_limit_bytes=vmem_limit_bytes,
        ),
    )(x2d, w, b)


# ------------------------------ wrapper --------------------------------------


def patch_embedding(x, weight, bias, patch_length, *,
                    block_m=512, block_n=256, block_k=None,
                    compute_dtype=None, out_dtype=None,
                    vmem_budget_bytes=None, vmem_limit_bytes=None):
    """x: (B, L, D); weight: (patch_length*D, embed_dim); bias: (embed_dim,).

    Returns (B, n_patch, embed_dim), matching the PyTorch module.
      * compute_dtype=jnp.bfloat16: x is read from HBM in its own dtype and
        cast to bf16 inside the kernel; accumulation/bias add stay f32.
      * out_dtype=jnp.bfloat16: halves output writeback (small-K configs).
    """
    B, L, D = x.shape
    n_patch = L // patch_length
    K = patch_length * D
    Kw, N = weight.shape
    assert Kw == K, "weight must be stored as (patch_length*in_dim, embed_dim)"

    out_dtype = x.dtype if out_dtype is None else out_dtype
    cdt = None
    if compute_dtype is not None and jnp.dtype(compute_dtype) != jnp.dtype(x.dtype):
        cdt = compute_dtype

    auto_budget, auto_limit = _vmem_policy()
    budget = auto_budget if vmem_budget_bytes is None else vmem_budget_bytes
    limit = auto_limit if vmem_limit_bytes is None else vmem_limit_bytes

    # Ragged-L truncation + patch flattening.  When L % patch_length == 0 the
    # slice is a no-op and the contiguous reshape is free, so the activation
    # is only read from HBM inside the kernel.  No dtype cast here (see top).
    x2d = x[:, : n_patch * patch_length, :].reshape(B * n_patch, K)
    w = weight if cdt is None else weight.astype(cdt)
    b = bias.astype(jnp.float32).reshape(1, N)   # f32 bias add, cast once here

    M = B * n_patch
    tm, tn, tk = _choose_tiles(
        M, N, K,
        jnp.dtype(x.dtype).itemsize, jnp.dtype(w.dtype).itemsize,
        jnp.dtype(out_dtype).itemsize,
        block_m, block_n, block_k, budget)

    out = _pallas_matmul_bias(x2d, w, b, tm=tm, tn=tn, tk=tk,
                              out_dtype=out_dtype, cdt=cdt,
                              vmem_limit_bytes=limit)
    return out.reshape(B, n_patch, N)


# ------------------------------- demo ----------------------------------------


if __name__ == "__main__":
    # Small deterministic example: ragged L (21 -> truncated to 20 = 5 patches).
    B, L, D = 3, 21, 8
    patch_length = 4
    embed_dim = 32
    in_features = patch_length * D  # 32

    key = jax.random.PRNGKey(0)
    kx, kw, kb = jax.random.split(key, 3)

    x = jax.random.normal(kx, (B, L, D), dtype=jnp.float32)

    # nn.Linear default init: U(-1/sqrt(fan_in), 1/sqrt(fan_in)).  Stored as
    # (in_features, embed_dim) so the kernel does x @ W (PyTorch keeps W^T).
    bound = 1.0 / jnp.sqrt(in_features)
    weight = jax.random.uniform(kw, (in_features, embed_dim), jnp.float32, -bound, bound)
    bias = jax.random.uniform(kb, (embed_dim,), jnp.float32, -bound, bound)

    n_patch = L // patch_length
    xp = x[:, : n_patch * patch_length, :].reshape(B, n_patch, in_features)
    ref = jnp.einsum("bpk,ke->bpe", xp, weight,
                     precision=jax.lax.Precision.HIGHEST) + bias

    # 1) f32 path: M = 15 rows -> two 8-row tiles (masked partial edge),
    #    N = 32 -> one 128-lane tile (masked partial edge).  No pads, no casts.
    out = patch_embedding(x, weight, bias, patch_length)
    out = jax.block_until_ready(out)
    assert out.shape == (B, n_patch, embed_dim)
    assert jnp.allclose(out, ref, atol=1e-5, rtol=1e-5)

    # 2) bf16-compute path: x stays f32 in HBM and is cast in-kernel; f32 MXU
    #    accumulation + f32 bias add, f32 output.
    out_bf16 = patch_embedding(x, weight, bias, patch_length,
                               compute_dtype=jnp.bfloat16)
    out_bf16 = jax.block_until_ready(out_bf16)
    assert out_bf16.shape == (B, n_patch, embed_dim)
    assert jnp.allclose(out_bf16, ref, atol=5e-2, rtol=5e-2)

    # 3) K-tiled path (reduction grid axis + f32 acc scratch + zero-masked
    #    partial K tail): K = 4*50 = 200, block_k=128 -> 2 K tiles, k_rem=72.
    B2, L2, D2, pl2, E2 = 2, 9, 50, 4, 128
    K2 = pl2 * D2
    kx2, kw2, kb2 = jax.random.split(jax.random.PRNGKey(1), 3)
    x2 = jax.random.normal(kx2, (B2, L2, D2), dtype=jnp.float32)
    w2 = jax.random.uniform(kw2, (K2, E2), jnp.float32, -0.1, 0.1)
    b2 = jax.random.uniform(kb2, (E2,), jnp.float32, -0.1, 0.1)
    np2 = L2 // pl2
    x2p = x2[:, : np2 * pl2, :].reshape(B2, np2, K2)
    ref2 = jnp.einsum("bpk,ke->bpe", x2p, w2,
                      precision=jax.lax.Precision.HIGHEST) + b2
    out2 = patch_embedding(x2, w2, b2, pl2, block_k=128)
    out2 = jax.block_until_ready(out2)
    assert out2.shape == (B2, np2, E2)
    assert jnp.allclose(out2, ref2, atol=1e-4, rtol=1e-4)

    print("KERNEL_OK")
</pallas_src>

<mosaic_0001>
module attributes {stable_mosaic.version = 11 : i64} {
  func.func @_mm_bias_kernel(%arg0: i32, %arg1: i32, %arg2: memref<8x32xf32, #tpu.memory_space<vmem>>, %arg3: memref<32x128xf32, #tpu.memory_space<vmem>>, %arg4: memref<1x128xf32, #tpu.memory_space<vmem>>, %arg5: memref<8x128xf32, #tpu.memory_space<vmem>>) attributes {dimension_semantics = [#tpu.dimension_semantics<parallel>, #tpu.dimension_semantics<parallel>], iteration_bounds = array<i64: 2, 1>, scalar_prefetch = 0 : i64, scratch_operands = 0 : i64, tpu.core_type = #tpu.core_type<tc>, window_params = [{transform_indices = @transform_0, window_bounds = array<i64: 8, 32>}, {transform_indices = @transform_1, window_bounds = array<i64: 32, 128>}, {transform_indices = @transform_2, window_bounds = array<i64: 1, 128>}, {transform_indices = @transform_3, window_bounds = array<i64: 8, 128>}]} {
    %c0 = arith.constant 0 : index
    %c0_0 = arith.constant 0 : index
    %0 = vector.load %arg2[%c0, %c0_0] : memref<8x32xf32, #tpu.memory_space<vmem>>, vector<8x32xf32>
    %c0_1 = arith.constant 0 : index
    %c0_2 = arith.constant 0 : index
    %1 = vector.load %arg3[%c0_1, %c0_2] : memref<32x128xf32, #tpu.memory_space<vmem>>, vector<32x128xf32>
    %cst = arith.constant dense<0.000000e+00> : vector<8x128xf32>
    %2 = tpu.matmul %0, %1, %cst {dimension_numbers = #tpu.dot_dimension_numbers<[1], [0], [0], [1], [0, 0, 1, 1], [], []>} : vector<8x32xf32>, vector<32x128xf32>, vector<8x128xf32> -> vector<8x128xf32>
    %c0_3 = arith.constant 0 : index
    %c0_4 = arith.constant 0 : index
    %3 = vector.load %arg4[%c0_3, %c0_4] : memref<1x128xf32, #tpu.memory_space<vmem>>, vector<1x128xf32>
    %4 = vector.broadcast %3 : vector<1x128xf32> to vector<8x128xf32>
    %5 = arith.addf %2, %4 : vector<8x128xf32>
    %c0_5 = arith.constant 0 : index
    %c0_6 = arith.constant 0 : index
    %6 = vector.load %arg5[%c0_5, %c0_6] : memref<8x128xf32, #tpu.memory_space<vmem>>, vector<8x128xf32>
    tpu.vector_store %arg5[%c0_5, %c0_6], %5 {strides = array<i32>} : memref<8x128xf32, #tpu.memory_space<vmem>>, vector<8x128xf32>,
    return
  }
  func.func @transform_0(%arg0: i32, %arg1: i32) -> (i32, i32) {
    %c0_i32 = arith.constant 0 : i32
    %c0_i32_0 = arith.constant 0 : i32
    return %arg0, %c0_i32 : i32, i32
  }
  func.func @transform_1(%arg0: i32, %arg1: i32) -> (i32, i32) {
    %c0_i32 = arith.constant 0 : i32
    %c0_i32_0 = arith.constant 0 : i32
    return %c0_i32, %arg1 : i32, i32
  }
  func.func @transform_2(%arg0: i32, %arg1: i32) -> (i32, i32) {
    %c0_i32 = arith.constant 0 : i32
    %c0_i32_0 = arith.constant 0 : i32
    return %c0_i32, %arg1 : i32, i32
  }
  func.func @transform_3(%arg0: i32, %arg1: i32) -> (i32, i32) {
    %c0_i32 = arith.constant 0 : i32
    return %arg0, %arg1 : i32, i32
  }
}

</mosaic_0001>

<bundles_post_ra>
// kernel: tpu_custom_call.1
= control target key start
LH: loop header
LB: loop body
LE: loop exit
PB: predicated region body
PF: predicated region fallthrough
CT: control target
= control target key end

     0   :  { %8 = vsyncpa [#allocation3], 0  ;;  %s895_s0 = inlined_call_operand.hbm [shape: f32[15,32], index: 0, kind: input, shape index: {}]   ;;  %s896_s1 = inlined_call_operand.hbm [shape: f32[32,32], index: 1, kind: input, shape index: {}]   ;;  %s897_s2 = inlined_call_operand.vmem [shape: f32[1,32], index: 2, kind: input, shape index: {}]   ;;  %s898_s3 = inlined_call_operand.hbm [shape: f32[15,32], index: 3, kind: output, shape index: {}]  }
   0x1   :  { %10 = vsyncpa [#allocation3 + $0x1], 0 }
   0x2   :  { %11 = vsyncpa [#allocation6], 0 }
   0x3   :  { %12 = vsyncpa [#allocation4], 0 }
   0x4   :  { %14 = vsyncpa [#allocation4 + $0x1], 0  ;;  %s719_s12 = smov 0   ;;  %s721_s13 = smov 0  }
   0x5   :  { %s723_s14 = smov 0   ;;  %s725_s15 = smov 0  }
   0x6   :  { %s727_s16 = smov 0   ;;  %s729_s17 = smov 0  }
   0x7 LB: > { %s441_s18 = sadd.s32 4294967295, %s690_s17   ;;  %s442_s19 = sadd.s32 4294967294, %s690_s17   ;;  %s690_s17 = sphi %s729_s17, %s20_s17   ;;  %s686_s16 = sphi %s727_s16, %s916_s16   ;;  %s682_s15 = sphi %s725_s15, %s915_s15   ;;  %s678_s14 = sphi %s723_s14, %s914_s14   ;;  %s674_s13 = sphi %s721_s13, %s913_s13   ;;  %s670_s12 = sphi %s719_s12, %s912_s12  }
   0x8   : > { %p52_p0 = scmp.ne.s32.totalorder %s674_s13, %s670_s12  ;;  %p753_p1 = scmp.eq.s32.totalorder %s441_s18, 0 }
   0x9   : > { %p757_p2 = scmp.eq.s32.totalorder %s441_s18, 1  ;;  %p136_p3 = scmp.eq.s32.totalorder %s442_s19, 1 }
   0xa   : > { %p763_p4 = por %p753_p1, %p52_p0  ;;  %p443_p5 = scmp.ge.s32.totalorder %s690_s17, 1 }
   0xb   : > { %p768_p6 = por %p136_p3, %p52_p0  ;;  %p143_p7 = scmp.lt.s32.totalorder %s690_s17, 3 }
   0xc   : > { %s902_s22 = scalar_select %p763_p4, 1, 0 }
   0xd   : > { %s903_s23 = scalar_select %p768_p6, 1, 0 }
   0xe   : > { %p773_p8 = pnand %p443_p5, %p143_p7  ;;  %s692_s25 = smov [#allocation5]  }
   0xf   : > { %s157_s26 = sshll.u32 %s692_s25, 4  ;;  %s32_s28 = sadd.s32 1, %s686_s16  ;;  %s158_s26 = int_to_ptr.vmem [resolvable:$true] %s157_s26 }
  0x10   : > { %p483_p9 = pneg %p773_p8  ;;  %s563_s29 = scalar_lea.vmem %s158_s26, 512 }
  0x11   : > { %p564_p13 = scmp.ne.s32.totalorder %s158_s26, %s563_s29  ;;  %p571_p5 = scmp.lt.s32.totalorder %s158_s26, %s158_s26 }
  0x12   : > { %p782_p11 = pnand %p483_p9, %p753_p1  ;;  %p572_p7 = scmp.lt.s32.totalorder %s563_s29, %s563_s29 }
  0x14   : > { %p554_p12 = pneg %p782_p11  ;;  %p573_p6 = por %p572_p7, %p571_p5 }
  0x16   : > { %p566_p0 = pnand %p564_p13, %p554_p12 }
  0x18   : > { %p567_p3 = pneg %p566_p0 }
  0x1a   : > { %p574_p4 = pnand %p573_p6, %p567_p3 }
  0x1c   : > { %577 = shalt.err (!%p574_p4)
}
  0x1d   : > { %s693_s30 = smov 128   ;;  %s694_s4 = smov 8  }
  0x1e   : > { %486 = dma.hbm_to_vmem [thread:$0]  (!%p782_p11), %s896_s1, 512, %s158_s26, [#allocation6], %s693_s30, %s693_s30, %s694_s4  }
  0x1f   : > { %p34_p6 = scmp.ge.s32.totalorder %s32_s28, 2  ;;  %s39_s7 = sadd.s32 1, %s678_s14 }
  0x20   : > { %p46_p4 = scmp.ne.s32.totalorder %s678_s14, %s674_s13  ;;  %p47_p9 = scmp.eq.s32.totalorder %s690_s17, 0 }
  0x21   : > { %s918_s28 = smov (%p34_p6, %s32_s28), 0  ;;  %p496_p0 = scmp.lt.s32.totalorder %s690_s17, 2 }
  0x22   : > { %p800_p12 = por %p47_p9, %p46_p4  ;;  %p806_p13 = por %p757_p2, %p46_p4 }
  0x23   : > { %s36_s10 = ssub.s32 %s686_s16, %s918_s28  ;;  %s177_s11 = sand.u32 1, %s678_s14  }
  0x24   : > { %p37_p11 = scmp.eq.s32.totalorder %s36_s10, 0  ;;  %s447_s18 = sshll.u32 %s177_s11, 3 }
  0x25   : > { %s448_s25 = sshll.u32 %s686_s16, 7  ;;  %s181_s30 = scalar_lea.vmem [#allocation2], %s447_s18 }
  0x26   : > { %s815_s19 = scalar_select %p37_p11, %s678_s14, %s39_s7  }
  0x27   : > { %s186_s29 = scalar_lea.hbm %s895_s0, %s448_s25  ;;  %s188_s4 = sshll.u32 %s181_s30, 4  ;;  %s189_s4 = int_to_ptr.vmem [resolvable:$true] %s188_s4 }
  0x28   : > { %p823_p2 = pnand %p496_p0, %p800_p12  ;;  %s178_s5 = scalar_lea.sflag [#allocation3], %s177_s11 }
  0x29   : > { %s591_s6 = scalar_lea.vmem %s189_s4, 128  ;;  %s695_s7 = smov [#allocation2]  }
  0x2a   : > { %p580_p3 = pneg %p823_p2  ;;  %p592_p5 = scmp.ne.s32.totalorder %s189_s4, %s591_s6 }
  0x2b   : > { %s596_s10 = sshll.u32 %s695_s7, 4  ;;  %s597_s10 = int_to_ptr.vmem [resolvable:$false] %s596_s10 }
  0x2c   : > { %p594_p7 = pnand %p592_p5, %p580_p3  ;;  %s598_s25 = scalar_lea.vmem %s597_s10, 256 }
  0x2d   : > { %p599_p4 = scmp.lt.s32.totalorder %s189_s4, %s597_s10  ;;  %p600_p9 = scmp.lt.s32.totalorder %s598_s25, %s591_s6 }
  0x2e   : > { %p595_p6 = pneg %p594_p7 }
  0x2f   : > { %p601_p11 = por %p600_p9, %p599_p4 }
  0x31   : > { %p602_p10 = pnand %p601_p11, %p595_p6 }
  0x33   : > { %605 = shalt.err (!%p602_p10)
}
  0x34   : > { %490 = dma.hbm_to_vmem [thread:$0]  (!%p823_p2), %s186_s29, 128, %s189_s4, %s178_s5  }
  0x35   : > { %197 = sbr.rel (%p773_p8) target bundleno = 278 (0x116), region = 32  ;;  %s834_s8 = sand.u32 (!%p773_p8), 1, %s674_s13  }
  0x36   : > { %s450_s11 = sshll.u32 (!%p773_p8), %s834_s8, 3  ;;  %s200_s18 = scalar_lea.sflag (!%p773_p8), [#allocation3], %s834_s8 }
  0x37   : > { %s203_s26 = scalar_lea.vmem (!%p773_p8), [#allocation2], %s450_s11  ;;  %p909_p12 = scmp.ne.s32.totalorder (!%p773_p8), %s902_s22, 0 }
  0x3a   : > { %657 = dma.done.wait (%p909_p12), %s200_s18, 128  }
  0x3b   : > { %659 = vsyncadd (%p909_p12), %s200_s18, 4294967168 }
  0x3c   : > { %661 = dma.done.wait (%p753_p1), [#allocation6], 512  }
  0x3d   : > { %663 = vsyncadd (%p753_p1), [#allocation6], 4294966784  ;;  %v696_v0 = vmov 0.0   ;;  %vm697_vm0 = vmmov 0   ;;  %v240_v1 = vld [vmem:[#allocation5 + $0x18] sm:$0xff]  ;;  %v239_v2 = vld [vmem:[#allocation5 + $0x10] sm:$0xff] }
  0x3e   : > { %464 = vmatprep.subr.mxu0 %v696_v0  ;;  %472 = vmatprep.mubr.msk.f32.mxu0 %vm697_vm0, %v696_v0  ;;  %v238_v3 = vld [vmem:[#allocation5 + $0x8] sm:$0xff]  ;;  %v237_v4 = vld [vmem:[#allocation5] sm:$0xff]  ;;  %v236_v5 = vld [vmem:[%s203_s26] sm:$0xff]  ;;  %vm248_vm1 = vcmask 261120   ;;  %s456_s24 = sshll.u32 %s682_s15, 7  ;;  %s232_s27 = scalar_lea.vmem [#allocation7], %s450_s11 }
  0x3f   : > { %465 = vmatpush3.msra.mxu0 %v240_v1  ;;  %v453_v6 = vld [vmem:[%s897_s2] ss:$0 sm:$0xff]  ;;  %s338_s29 = sshll.u32 %s232_s27, 4  ;;  %s853_s21 = scalar_lea.hbm %s898_s3, %s456_s24  ;;  %s339_s29 = int_to_ptr.vmem [resolvable:$true] %s338_s29 }
  0x40   : > { %466 = vmatprep.subr.mxu0 %v696_v0  ;;  %s324_s5 = scalar_lea.sflag [#allocation4], %s834_s8  ;;  %s606_s6 = scalar_lea.vmem %s339_s29, 128 }
  0x41   : > { %467 = vmatpush3.msra.mxu0 %v239_v2  ;;  %p607_p1 = scmp.ne.s32.totalorder %s339_s29, %s606_s6  ;;  %s698_s7 = smov [#allocation7]  }
  0x42   : > { %468 = vmatprep.subr.mxu0 %v696_v0  ;;  %s610_s15 = sshll.u32 %s698_s7, 4  ;;  %s611_s15 = int_to_ptr.vmem [resolvable:$false] %s610_s15 }
  0x43   : > { %469 = vmatpush3.msra.mxu0 %v238_v3  ;;  %p608_p8 = pnand %p607_p1, %p806_p13  ;;  %s612_s10 = scalar_lea.vmem %s611_s15, 256 }
  0x44   : > { %470 = vmatprep.subr.mxu0 %v696_v0  ;;  %p613_p0 = scmp.lt.s32.totalorder %s339_s29, %s611_s15  ;;  %p614_p2 = scmp.lt.s32.totalorder %s612_s10, %s606_s6 }
  0x45   : > { %471 = vmatpush3.msra.mxu0 %v237_v4  ;;  %p609_p10 = pneg %p608_p8 }
  0x46   : > { %473 = vmatmul.mubr.msk.f32.vlgmr.msra.gmra.mxu0 %vm248_vm1, %v236_v5  ;;  %p615_p3 = por %p614_p2, %p613_p0 }
  0x48   : > { %p616_p5 = pnand %p615_p3, %p609_p10 }
 0x106   : > { %v318_v7 = vpop.f32.mrf.mxu0 }
 0x107   : > { %v319_v8 = vadd.f32 %v453_v6, %v318_v7 }
 0x108   : > { %v474_v9 = vpop.f32.mrf.mxu0 }
 0x109   : > { %322 = vst [vmem:[%s232_s27] sm:$0xff] %v319_v8 }
 0x10a   : > { %619 = shalt.err (!%p616_p5)
}
 0x10b   : > { %s620_s25 = scalar_lea.hbm %s853_s21, 128  ;;  %s624_s18 = scalar_lea.hbm %s898_s3, 256 }
 0x10c   : > { %p621_p7 = scmp.ne.s32.totalorder %s853_s21, %s620_s25  ;;  %p625_p9 = scmp.lt.s32.totalorder %s853_s21, %s898_s3 }
 0x10d   : > { %p626_p11 = scmp.lt.s32.totalorder %s624_s18, %s620_s25 }
 0x10e   : > { %p622_p6 = pnand %p621_p7, %p806_p13 }
 0x10f   : > { %p627_p12 = por %p626_p11, %p625_p9 }
 0x110   : > { %p623_p4 = pneg %p622_p6 }
 0x112   : > { %p628_p1 = pnand %p627_p12, %p623_p4 }
 0x114   : > { %631 = shalt.err (!%p628_p1)
}
 0x115   : > { %481 = dma.vmem_to_hbm [thread:$0]  (%p806_p13), %s339_s29, 128, %s853_s21, %s324_s5  }
 0x116 PF: > { %s350_s22 = sand.u32 1, %s670_s12   ;;  %p910_p8 = scmp.ne.s32.totalorder %s903_s23, 0 }
 0x117   : > { %p911_p10 = scmp.ge.s32.totalorder %s690_s17, 2  ;;  %s351_s24 = scalar_lea.sflag [#allocation4], %s350_s22 }
 0x119   : > { %p492_p0 = pnand %p911_p10, %p910_p8 }
 0x11b   : > { %p493_p2 = pneg %p492_p0 }
 0x11d   : > { %665 = dma.done.wait (%p493_p2), %s351_s24, 128  }
 0x11e   : > { %667 = vsyncadd (%p493_p2), %s351_s24, 4294967168  ;;  %s20_s17 = sadd.s32 1, %s690_s17   ;;  %s912_s12 = smov %s674_s13 }
 0x11f   : > { %p17_p3 = scmp.ge.s32.totalorder %s20_s17, 4   ;;  %s913_s13 = smov %s678_s14 }
 0x120   : > { %s914_s14 = smov %s815_s19  ;;  %s915_s15 = smov %s686_s16 }
 0x121   : > { %s916_s16 = smov %s918_s28  ;;  %19 = sbr.rel (!%p17_p3) target bundleno = 7 (0x7), region = 85 }
 0x126   :  { %356 = vsyncpa [#allocation3], 1 }
 0x127   :  { %358 = vsyncpa [#allocation3 + $0x1], 1 }
 0x128   :  { %359 = vsyncpa [#allocation6], 1 }
 0x129   :  { %360 = vsyncpa [#allocation4], 1 }
 0x12a   :  { %362 = vsyncpa [#allocation4 + $0x1], 1 }

</bundles_post_ra>
